<compile_context>
chip_gen: v7x
topology: tpu7x:2x2x1
jax: 0.10.0
libtpu: 0.0.40
codegen_flags: <defaults>
</compile_context>

<pallas_src>
import jax
import jax.numpy as jnp
from jax.experimental import pallas as pl
from jax.experimental.pallas import tpu as pltpu

H0, H1, H2, H3 = 100, 200, 200, 100  # hidden sizes from FFNet.__init__
BN_EPS = 1e-5
LANE = 128
SUBLANE = 8


def _pad_to(n, m):
    return ((n + m - 1) // m) * m


def ffnet_kernel(
    x_ref,
    w0_ref, c0_ref,
    w1_ref, c1_ref,
    w2_ref, c2_ref,
    w3_ref, b3_ref,
    w4_ref, b4_ref,
    o_ref,
):
    """Fused forward for one batch tile.

    x / weights / inter-layer activations are bf16; matmuls accumulate in f32
    on the MXU; bias add + ReLU run in f32, then cast back to bf16.
    """

    def layer(h, w_ref, c_ref):
        acc = jnp.dot(h, w_ref[...], preferred_element_type=jnp.float32)
        return jnp.maximum(acc + c_ref[...], 0.0).astype(jnp.bfloat16)

    h = x_ref[...]                 # already bf16
    h = layer(h, w0_ref, c0_ref)   # fc0 + folded bn1 + relu (dropout = id in eval)
    h = layer(h, w1_ref, c1_ref)   # fc1 + folded bn2 + relu
    h = layer(h, w2_ref, c2_ref)   # fc2 + folded bn3 + relu
    h = layer(h, w3_ref, b3_ref)   # fc3 + relu

    # fc4 (no activation)
    o_ref[...] = (
        jnp.dot(h, w4_ref[...], preferred_element_type=jnp.float32) + b4_ref[...]
    ).astype(o_ref.dtype)


def _fold_and_pad(w, b, scale, shift, in_pad, out_pad):
    """Fold BN scale/shift into Linear weight/bias, zero-pad to lane shapes."""
    in_f, out_f = w.shape
    if scale is not None:
        w = w * scale[None, :]
        b = b * scale + shift
    w_p = jnp.zeros((in_pad, out_pad), jnp.float32).at[:in_f, :out_f].set(w)
    b_p = jnp.zeros((1, out_pad), jnp.float32).at[0, :out_f].set(b)
    return w_p.astype(jnp.bfloat16), b_p  # bias stays f32


def ffnet_forward(x, params, *, batch_tile=2048, full_output=False):
    """x: (B, input_dim) float32. params: dict of weights (see init_params).

    Returns (B, output_dim) f32 by default. With full_output=True returns the
    padded (b_pad, out_pad) kernel output (padded feature columns are exact
    zeros; padded batch rows are bias-propagated garbage the caller must
    ignore) and skips the wrapper slice-copy.
    """
    B, input_dim = x.shape
    output_dim = params["w4"].shape[1]

    # Padded (lane-dense) feature sizes.
    in_pad = _pad_to(input_dim, LANE)
    h0_pad = _pad_to(H0, LANE)
    h1_pad = _pad_to(H1, LANE)
    h2_pad = _pad_to(H2, LANE)
    h3_pad = _pad_to(H3, LANE)
    out_pad = _pad_to(output_dim, LANE)

    # Batch tiling: multiple of 8 sublanes; clamp for small batches; cap so
    # the grid has >= 2 steps when the batch allows it (v7x: 2 TensorCores).
    b_sub = _pad_to(B, SUBLANE)
    bt = min(batch_tile, b_sub)
    if b_sub >= 2 * SUBLANE:
        bt = min(bt, _pad_to(-(-b_sub // 2), SUBLANE))
    bt = _pad_to(bt, SUBLANE)
    b_pad = _pad_to(B, bt)

    # BN (inference) fold into preceding Linear (glue, plain JAX).
    def bn_fold(g, beta, mean, var):
        scale = g / jnp.sqrt(var + BN_EPS)
        shift = beta - mean * scale
        return scale, shift

    s1, t1 = bn_fold(params["bn1_g"], params["bn1_b"], params["bn1_m"], params["bn1_v"])
    s2, t2 = bn_fold(params["bn2_g"], params["bn2_b"], params["bn2_m"], params["bn2_v"])
    s3, t3 = bn_fold(params["bn3_g"], params["bn3_b"], params["bn3_m"], params["bn3_v"])

    w0, c0 = _fold_and_pad(params["w0"], params["b0"], s1, t1, in_pad, h0_pad)
    w1, c1 = _fold_and_pad(params["w1"], params["b1"], s2, t2, h0_pad, h1_pad)
    w2, c2 = _fold_and_pad(params["w2"], params["b2"], s3, t3, h1_pad, h2_pad)
    w3, b3 = _fold_and_pad(params["w3"], params["b3"], None, None, h2_pad, h3_pad)
    w4, b4 = _fold_and_pad(params["w4"], params["b4"], None, None, h3_pad, out_pad)

    # Cast to bf16 and zero-pad in one fused XLA pass; skip pad when aligned.
    x_b = x.astype(jnp.bfloat16)
    if b_pad != B or in_pad != input_dim:
        x_b = jnp.pad(x_b, ((0, b_pad - B), (0, in_pad - input_dim)))

    operands = (x_b, w0, c0, w1, c1, w2, c2, w3, b3, w4, b4)

    # Weights / bias vectors: full-extent blocks, same block index every grid
    # step => VMEM-resident, not re-DMA'd per step.
    def full_spec(arr):
        return pl.BlockSpec(arr.shape, lambda i: (0, 0))

    in_specs = [pl.BlockSpec((bt, in_pad), lambda i: (i, 0))]
    in_specs += [full_spec(a) for a in operands[1:]]
    out_spec = pl.BlockSpec((bt, out_pad), lambda i: (i, 0))

    out = pl.pallas_call(
        ffnet_kernel,
        out_shape=jax.ShapeDtypeStruct((b_pad, out_pad), jnp.float32),
        grid_spec=pltpu.PrefetchScalarGridSpec(
            num_scalar_prefetch=0,
            grid=(b_pad // bt,),
            in_specs=in_specs,
            out_specs=out_spec,
        ),
        compiler_params=pltpu.CompilerParams(
            dimension_semantics=("parallel",),
            # Budgeted against v7x's 64 MiB physical VMEM per TC; at bt=2048
            # the live footprint (bf16 x + f32 out, double-buffered, + ~0.3 MiB
            # resident weights + bf16 intermediates) is only a few MiB.
            vmem_limit_bytes=32 << 20,
        ),
    )(*operands)

    if full_output:
        return out
    return out[:B, :output_dim]


def init_params(key, input_dim, output_dim):
    """Deterministic synthetic parameters matching FFNet.__init__ shapes.

    Linear weights are stored as (in_features, out_features) == torch weight.T.
    """
    ks = jax.random.split(key, 32)
    ki = iter(range(32))

    def lin(in_f, out_f):
        bound = 1.0 / jnp.sqrt(in_f)
        w = jax.random.uniform(ks[next(ki)], (in_f, out_f), jnp.float32, -bound, bound)
        b = jax.random.uniform(ks[next(ki)], (out_f,), jnp.float32, -bound, bound)
        return w, b

    def bn(n):
        g = 1.0 + 0.1 * jax.random.normal(ks[next(ki)], (n,), jnp.float32)
        b = 0.1 * jax.random.normal(ks[next(ki)], (n,), jnp.float32)
        m = 0.1 * jax.random.normal(ks[next(ki)], (n,), jnp.float32)
        v = jax.random.uniform(ks[next(ki)], (n,), jnp.float32, 0.5, 1.5)
        return g, b, m, v

    p = {}
    p["w0"], p["b0"] = lin(input_dim, H0)
    p["bn1_g"], p["bn1_b"], p["bn1_m"], p["bn1_v"] = bn(H0)
    p["w1"], p["b1"] = lin(H0, H1)
    p["bn2_g"], p["bn2_b"], p["bn2_m"], p["bn2_v"] = bn(H1)
    p["w2"], p["b2"] = lin(H1, H2)
    p["bn3_g"], p["bn3_b"], p["bn3_m"], p["bn3_v"] = bn(H2)
    p["w3"], p["b3"] = lin(H2, H3)
    p["w4"], p["b4"] = lin(H3, output_dim)
    return p


def ffnet_reference(x, params):
    """Pure-JAX f32 reference (eval-mode semantics) for correctness check."""
    def bn(h, g, b, m, v):
        return (h - m) / jnp.sqrt(v + BN_EPS) * g + b

    h = x @ params["w0"] + params["b0"]
    h = jax.nn.relu(bn(h, params["bn1_g"], params["bn1_b"], params["bn1_m"], params["bn1_v"]))
    h = h @ params["w1"] + params["b1"]
    h = jax.nn.relu(bn(h, params["bn2_g"], params["bn2_b"], params["bn2_m"], params["bn2_v"]))
    h = h @ params["w2"] + params["b2"]
    h = jax.nn.relu(bn(h, params["bn3_g"], params["bn3_b"], params["bn3_m"], params["bn3_v"]))
    h = h @ params["w3"] + params["b3"]
    h = jax.nn.relu(h)
    return h @ params["w4"] + params["b4"]


if __name__ == "__main__":
    input_dim, output_dim = 32, 8
    batch = 8

    key = jax.random.PRNGKey(0)
    kx, kp = jax.random.split(key)
    x = jax.random.normal(kx, (batch, input_dim), jnp.float32)
    params = init_params(kp, input_dim, output_dim)

    out = ffnet_forward(x, params)
    out = jax.block_until_ready(out)

    ref = ffnet_reference(x, params)
    assert out.shape == (batch, output_dim), out.shape
    # bf16 matmul inputs / intermediates (f32 accumulation) => loosened
    # tolerance vs the f32 reference.
    assert jnp.allclose(out, ref, atol=5e-2, rtol=5e-2), (
        f"max abs err {jnp.max(jnp.abs(out - ref))}"
    )
    print("KERNEL_OK")
</pallas_src>

<mosaic_0001>
module attributes {stable_mosaic.version = 11 : i64} {
  func.func @ffnet_kernel(%arg0: i32, %arg1: memref<8x128xbf16, #tpu.memory_space<vmem>>, %arg2: memref<128x128xbf16, #tpu.memory_space<vmem>>, %arg3: memref<1x128xf32, #tpu.memory_space<vmem>>, %arg4: memref<128x256xbf16, #tpu.memory_space<vmem>>, %arg5: memref<1x256xf32, #tpu.memory_space<vmem>>, %arg6: memref<256x256xbf16, #tpu.memory_space<vmem>>, %arg7: memref<1x256xf32, #tpu.memory_space<vmem>>, %arg8: memref<256x128xbf16, #tpu.memory_space<vmem>>, %arg9: memref<1x128xf32, #tpu.memory_space<vmem>>, %arg10: memref<128x128xbf16, #tpu.memory_space<vmem>>, %arg11: memref<1x128xf32, #tpu.memory_space<vmem>>, %arg12: memref<8x128xf32, #tpu.memory_space<vmem>>) attributes {dimension_semantics = [#tpu.dimension_semantics<parallel>], iteration_bounds = array<i64: 1>, scalar_prefetch = 0 : i64, scratch_operands = 0 : i64, tpu.core_type = #tpu.core_type<tc>, window_params = [{transform_indices = @transform_0, window_bounds = array<i64: 8, 128>}, {pipeline_mode = #tpu.pipeline_mode<synchronous>, transform_indices = @transform_1, window_bounds = array<i64: 128, 128>}, {pipeline_mode = #tpu.pipeline_mode<synchronous>, transform_indices = @transform_2, window_bounds = array<i64: 1, 128>}, {pipeline_mode = #tpu.pipeline_mode<synchronous>, transform_indices = @transform_3, window_bounds = array<i64: 128, 256>}, {pipeline_mode = #tpu.pipeline_mode<synchronous>, transform_indices = @transform_4, window_bounds = array<i64: 1, 256>}, {pipeline_mode = #tpu.pipeline_mode<synchronous>, transform_indices = @transform_5, window_bounds = array<i64: 256, 256>}, {pipeline_mode = #tpu.pipeline_mode<synchronous>, transform_indices = @transform_6, window_bounds = array<i64: 1, 256>}, {pipeline_mode = #tpu.pipeline_mode<synchronous>, transform_indices = @transform_7, window_bounds = array<i64: 256, 128>}, {pipeline_mode = #tpu.pipeline_mode<synchronous>, transform_indices = @transform_8, window_bounds = array<i64: 1, 128>}, {pipeline_mode = #tpu.pipeline_mode<synchronous>, transform_indices = @transform_9, window_bounds = array<i64: 128, 128>}, {pipeline_mode = #tpu.pipeline_mode<synchronous>, transform_indices = @transform_10, window_bounds = array<i64: 1, 128>}, {transform_indices = @transform_11, window_bounds = array<i64: 8, 128>}]} {
    %c0 = arith.constant 0 : index
    %c0_0 = arith.constant 0 : index
    %0 = vector.load %arg1[%c0, %c0_0] : memref<8x128xbf16, #tpu.memory_space<vmem>>, vector<8x128xbf16>
    %c0_1 = arith.constant 0 : index
    %c0_2 = arith.constant 0 : index
    %1 = vector.load %arg2[%c0_1, %c0_2] : memref<128x128xbf16, #tpu.memory_space<vmem>>, vector<128x128xbf16>
    %cst = arith.constant dense<0.000000e+00> : vector<8x128xf32>
    %2 = tpu.matmul %0, %1, %cst {dimension_numbers = #tpu.dot_dimension_numbers<[1], [0], [0], [1], [0, 0, 1, 1], [], []>} : vector<8x128xbf16>, vector<128x128xbf16>, vector<8x128xf32> -> vector<8x128xf32>
    %c0_3 = arith.constant 0 : index
    %c0_4 = arith.constant 0 : index
    %3 = vector.load %arg3[%c0_3, %c0_4] : memref<1x128xf32, #tpu.memory_space<vmem>>, vector<1x128xf32>
    %4 = vector.broadcast %3 : vector<1x128xf32> to vector<8x128xf32>
    %5 = arith.addf %2, %4 : vector<8x128xf32>
    %cst_5 = arith.constant 0.000000e+00 : f32
    %6 = vector.broadcast %cst_5 : f32 to vector<8x128xf32>
    %7 = arith.maximumf %5, %6 : vector<8x128xf32>
    %8 = arith.truncf %7 : vector<8x128xf32> to vector<8x128xbf16>
    %c0_6 = arith.constant 0 : index
    %c0_7 = arith.constant 0 : index
    %9 = vector.load %arg4[%c0_6, %c0_7] : memref<128x256xbf16, #tpu.memory_space<vmem>>, vector<128x256xbf16>
    %cst_8 = arith.constant dense<0.000000e+00> : vector<8x256xf32>
    %10 = tpu.matmul %8, %9, %cst_8 {dimension_numbers = #tpu.dot_dimension_numbers<[1], [0], [0], [1], [0, 0, 1, 1], [], []>} : vector<8x128xbf16>, vector<128x256xbf16>, vector<8x256xf32> -> vector<8x256xf32>
    %c0_9 = arith.constant 0 : index
    %c0_10 = arith.constant 0 : index
    %11 = vector.load %arg5[%c0_9, %c0_10] : memref<1x256xf32, #tpu.memory_space<vmem>>, vector<1x256xf32>
    %12 = vector.broadcast %11 : vector<1x256xf32> to vector<8x256xf32>
    %13 = arith.addf %10, %12 : vector<8x256xf32>
    %cst_11 = arith.constant 0.000000e+00 : f32
    %14 = vector.broadcast %cst_11 : f32 to vector<8x256xf32>
    %15 = arith.maximumf %13, %14 : vector<8x256xf32>
    %16 = arith.truncf %15 : vector<8x256xf32> to vector<8x256xbf16>
    %c0_12 = arith.constant 0 : index
    %c0_13 = arith.constant 0 : index
    %17 = vector.load %arg6[%c0_12, %c0_13] : memref<256x256xbf16, #tpu.memory_space<vmem>>, vector<256x256xbf16>
    %cst_14 = arith.constant dense<0.000000e+00> : vector<8x256xf32>
    %18 = tpu.matmul %16, %17, %cst_14 {dimension_numbers = #tpu.dot_dimension_numbers<[1], [0], [0], [1], [0, 0, 1, 1], [], []>} : vector<8x256xbf16>, vector<256x256xbf16>, vector<8x256xf32> -> vector<8x256xf32>
    %c0_15 = arith.constant 0 : index
    %c0_16 = arith.constant 0 : index
    %19 = vector.load %arg7[%c0_15, %c0_16] : memref<1x256xf32, #tpu.memory_space<vmem>>, vector<1x256xf32>
    %20 = vector.broadcast %19 : vector<1x256xf32> to vector<8x256xf32>
    %21 = arith.addf %18, %20 : vector<8x256xf32>
    %cst_17 = arith.constant 0.000000e+00 : f32
    %22 = vector.broadcast %cst_17 : f32 to vector<8x256xf32>
    %23 = arith.maximumf %21, %22 : vector<8x256xf32>
    %24 = arith.truncf %23 : vector<8x256xf32> to vector<8x256xbf16>
    %c0_18 = arith.constant 0 : index
    %c0_19 = arith.constant 0 : index
    %25 = vector.load %arg8[%c0_18, %c0_19] : memref<256x128xbf16, #tpu.memory_space<vmem>>, vector<256x128xbf16>
    %cst_20 = arith.constant dense<0.000000e+00> : vector<8x128xf32>
    %26 = tpu.matmul %24, %25, %cst_20 {dimension_numbers = #tpu.dot_dimension_numbers<[1], [0], [0], [1], [0, 0, 1, 1], [], []>} : vector<8x256xbf16>, vector<256x128xbf16>, vector<8x128xf32> -> vector<8x128xf32>
    %c0_21 = arith.constant 0 : index
    %c0_22 = arith.constant 0 : index
    %27 = vector.load %arg9[%c0_21, %c0_22] : memref<1x128xf32, #tpu.memory_space<vmem>>, vector<1x128xf32>
    %28 = vector.broadcast %27 : vector<1x128xf32> to vector<8x128xf32>
    %29 = arith.addf %26, %28 : vector<8x128xf32>
    %cst_23 = arith.constant 0.000000e+00 : f32
    %30 = vector.broadcast %cst_23 : f32 to vector<8x128xf32>
    %31 = arith.maximumf %29, %30 : vector<8x128xf32>
    %32 = arith.truncf %31 : vector<8x128xf32> to vector<8x128xbf16>
    %c0_24 = arith.constant 0 : index
    %c0_25 = arith.constant 0 : index
    %33 = vector.load %arg10[%c0_24, %c0_25] : memref<128x128xbf16, #tpu.memory_space<vmem>>, vector<128x128xbf16>
    %cst_26 = arith.constant dense<0.000000e+00> : vector<8x128xf32>
    %34 = tpu.matmul %32, %33, %cst_26 {dimension_numbers = #tpu.dot_dimension_numbers<[1], [0], [0], [1], [0, 0, 1, 1], [], []>} : vector<8x128xbf16>, vector<128x128xbf16>, vector<8x128xf32> -> vector<8x128xf32>
    %c0_27 = arith.constant 0 : index
    %c0_28 = arith.constant 0 : index
    %35 = vector.load %arg11[%c0_27, %c0_28] : memref<1x128xf32, #tpu.memory_space<vmem>>, vector<1x128xf32>
    %36 = vector.broadcast %35 : vector<1x128xf32> to vector<8x128xf32>
    %37 = arith.addf %34, %36 : vector<8x128xf32>
    %c0_29 = arith.constant 0 : index
    %c0_30 = arith.constant 0 : index
    %38 = vector.load %arg12[%c0_29, %c0_30] : memref<8x128xf32, #tpu.memory_space<vmem>>, vector<8x128xf32>
    tpu.vector_store %arg12[%c0_29, %c0_30], %37 {strides = array<i32>} : memref<8x128xf32, #tpu.memory_space<vmem>>, vector<8x128xf32>,
    return
  }
  func.func @transform_0(%arg0: i32) -> (i32, i32) {
    %c0_i32 = arith.constant 0 : i32
    %c0_i32_0 = arith.constant 0 : i32
    return %arg0, %c0_i32 : i32, i32
  }
  func.func @transform_1(%arg0: i32) -> (i32, i32) {
    %c0_i32 = arith.constant 0 : i32
    %c0_i32_0 = arith.constant 0 : i32
    %c0_i32_1 = arith.constant 0 : i32
    return %c0_i32, %c0_i32_0 : i32, i32
  }
  func.func @transform_2(%arg0: i32) -> (i32, i32) {
    %c0_i32 = arith.constant 0 : i32
    %c0_i32_0 = arith.constant 0 : i32
    %c0_i32_1 = arith.constant 0 : i32
    return %c0_i32, %c0_i32_0 : i32, i32
  }
  func.func @transform_3(%arg0: i32) -> (i32, i32) {
    %c0_i32 = arith.constant 0 : i32
    %c0_i32_0 = arith.constant 0 : i32
    %c0_i32_1 = arith.constant 0 : i32
    return %c0_i32, %c0_i32_0 : i32, i32
  }
  func.func @transform_4(%arg0: i32) -> (i32, i32) {
    %c0_i32 = arith.constant 0 : i32
    %c0_i32_0 = arith.constant 0 : i32
    %c0_i32_1 = arith.constant 0 : i32
    return %c0_i32, %c0_i32_0 : i32, i32
  }
  func.func @transform_5(%arg0: i32) -> (i32, i32) {
    %c0_i32 = arith.constant 0 : i32
    %c0_i32_0 = arith.constant 0 : i32
    %c0_i32_1 = arith.constant 0 : i32
    return %c0_i32, %c0_i32_0 : i32, i32
  }
  func.func @transform_6(%arg0: i32) -> (i32, i32) {
    %c0_i32 = arith.constant 0 : i32
    %c0_i32_0 = arith.constant 0 : i32
    %c0_i32_1 = arith.constant 0 : i32
    return %c0_i32, %c0_i32_0 : i32, i32
  }
  func.func @transform_7(%arg0: i32) -> (i32, i32) {
    %c0_i32 = arith.constant 0 : i32
    %c0_i32_0 = arith.constant 0 : i32
    %c0_i32_1 = arith.constant 0 : i32
    return %c0_i32, %c0_i32_0 : i32, i32
  }
  func.func @transform_8(%arg0: i32) -> (i32, i32) {
    %c0_i32 = arith.constant 0 : i32
    %c0_i32_0 = arith.constant 0 : i32
    %c0_i32_1 = arith.constant 0 : i32
    return %c0_i32, %c0_i32_0 : i32, i32
  }
  func.func @transform_9(%arg0: i32) -> (i32, i32) {
    %c0_i32 = arith.constant 0 : i32
    %c0_i32_0 = arith.constant 0 : i32
    %c0_i32_1 = arith.constant 0 : i32
    return %c0_i32, %c0_i32_0 : i32, i32
  }
  func.func @transform_10(%arg0: i32) -> (i32, i32) {
    %c0_i32 = arith.constant 0 : i32
    %c0_i32_0 = arith.constant 0 : i32
    %c0_i32_1 = arith.constant 0 : i32
    return %c0_i32, %c0_i32_0 : i32, i32
  }
  func.func @transform_11(%arg0: i32) -> (i32, i32) {
    %c0_i32 = arith.constant 0 : i32
    %c0_i32_0 = arith.constant 0 : i32
    return %arg0, %c0_i32 : i32, i32
  }
}

</mosaic_0001>

<bundles_post_ra>
// kernel: tpu_custom_call.1
= control target key start
LH: loop header
LB: loop body
LE: loop exit
PB: predicated region body
PF: predicated region fallthrough
CT: control target
= control target key end

     0   :  { %16 = vsyncpa [#allocation3], 0  ;;  %s1596_s0 = inlined_call_operand.hbm [shape: bf16[8,128], index: 0, kind: input, shape index: {}]   ;;  %s1597_s1 = inlined_call_operand.hbm [shape: bf16[128,128], index: 1, kind: input, shape index: {}]   ;;  %s1598_s2 = inlined_call_operand.vmem [shape: f32[1,128], index: 2, kind: input, shape index: {}]   ;;  %s1599_s3 = inlined_call_operand.hbm [shape: bf16[128,256], index: 3, kind: input, shape index: {}]   ;;  %s1600_s4 = inlined_call_operand.vmem [shape: f32[1,256], index: 4, kind: input, shape index: {}]   ;;  %s1601_s5 = inlined_call_operand.hbm [shape: bf16[256,256], index: 5, kind: input, shape index: {}]   ;;  %s1602_s6 = inlined_call_operand.vmem [shape: f32[1,256], index: 6, kind: input, shape index: {}]   ;;  %s1603_s7 = inlined_call_operand.hbm [shape: bf16[256,128], index: 7, kind: input, shape index: {}]   ;;  %s1604_s8 = inlined_call_operand.vmem [shape: f32[1,128], index: 8, kind: input, shape index: {}]   ;;  %s1605_s9 = inlined_call_operand.hbm [shape: bf16[128,128], index: 9, kind: input, shape index: {}]   ;;  %s1606_s10 = inlined_call_operand.vmem [shape: f32[1,128], index: 10, kind: input, shape index: {}]   ;;  %s1607_s11 = inlined_call_operand.hbm [shape: f32[8,128], index: 11, kind: output, shape index: {}]  }
   0x1   :  { %17 = vsyncpa [#allocation6], 0 }
   0x2   :  { %18 = vsyncpa [#allocation9], 0 }
   0x3   :  { %19 = vsyncpa [#allocation12], 0 }
   0x4   :  { %20 = vsyncpa [#allocation4], 0  ;;  %s1388_s17 = smov [#allocation5]   ;;  %s1224_s21 = scalar_lea.hbm %s1597_s1, 1024 }
   0x5   :  { %s36_s18 = sshll.u32 %s1388_s17, 4  ;;  %p1225_p0 = scmp.ne.s32.totalorder %s1597_s1, %s1224_s21  ;;  %s37_s18 = int_to_ptr.vmem [resolvable:$true] %s36_s18 }
   0x6   :  { %p1228_p1 = scmp.lt.u32.totalorder %s1224_s21, %s1597_s1 }
   0x8   :  { %p1230_p2 = pnand %p1228_p1, %p1225_p0 }
   0xa   :  { %1233 = shalt.err (!%p1230_p2)
}
   0xb   :  { %s1234_s26 = scalar_lea.vmem %s37_s18, 1024  ;;  %p1239_p4 = scmp.lt.s32.totalorder %s37_s18, %s37_s18 }
   0xc   :  { %p1235_p3 = scmp.ne.s32.totalorder %s37_s18, %s1234_s26  ;;  %p1240_p5 = scmp.lt.s32.totalorder %s1234_s26, %s1234_s26 }
   0xe   :  { %p1241_p6 = por %p1240_p5, %p1239_p4 }
  0x10   :  { %p1242_p7 = pnand %p1241_p6, %p1235_p3 }
  0x12   :  { %1245 = shalt.err (!%p1242_p7)
}
  0x13   :  { %s1389_s27 = smov 64   ;;  %s1390_s28 = smov 4  }
  0x14   :  { %42 = dma.hbm_to_vmem [thread:$0]  %s1597_s1, 1024, %s37_s18, [#allocation6], %s1389_s27, %s1389_s27, %s1390_s28  }
  0x15   :  { %s1391_s12 = smov [#allocation8]   ;;  %s1392_s14 = smov [#allocation2]  }
  0x16   :  { %s64_s13 = sshll.u32 %s1391_s12, 4  ;;  %s27_s15 = sshll.u32 %s1392_s14, 4  ;;  %s65_s13 = int_to_ptr.vmem [resolvable:$true] %s64_s13  ;;  %s28_s15 = int_to_ptr.vmem [resolvable:$true] %s27_s15 }
  0x17   :  { %s1246_s19 = scalar_lea.hbm %s1601_s5, 4096 }
  0x18   :  { %p1247_p8 = scmp.ne.s32.totalorder %s1601_s5, %s1246_s19  ;;  %p1250_p9 = scmp.lt.u32.totalorder %s1246_s19, %s1601_s5 }
  0x1a   :  { %p1252_p10 = pnand %p1250_p9, %p1247_p8 }
  0x1c   :  { %1255 = shalt.err (!%p1252_p10)
}
  0x1d   :  { %s1256_s1 = scalar_lea.vmem %s65_s13, 4096  ;;  %p1261_p12 = scmp.lt.s32.totalorder %s65_s13, %s65_s13 }
  0x1e   :  { %p1257_p11 = scmp.ne.s32.totalorder %s65_s13, %s1256_s1  ;;  %p1262_p13 = scmp.lt.s32.totalorder %s1256_s1, %s1256_s1 }
  0x20   :  { %p1263_p0 = por %p1262_p13, %p1261_p12 }
  0x22   :  { %p1264_p1 = pnand %p1263_p0, %p1257_p11 }
  0x24   :  { %1267 = shalt.err (!%p1264_p1)
}
  0x25   :  { %s1393_s18 = smov 128   ;;  %s1394_s24 = smov 8  }
  0x26   :  { %70 = dma.hbm_to_vmem [thread:$0]  %s1601_s5, 4096, %s65_s13, [#allocation9], %s1393_s18, %s1393_s18, %s1394_s24  }
  0x27   :  { %s1268_s12 = scalar_lea.hbm %s1596_s0, 64 }
  0x28   :  { %p1269_p2 = scmp.ne.s32.totalorder %s1596_s0, %s1268_s12  ;;  %p1272_p3 = scmp.lt.u32.totalorder %s1268_s12, %s1596_s0 }
  0x2a   :  { %p1274_p4 = pnand %p1272_p3, %p1269_p2 }
  0x2c   :  { %1277 = shalt.err (!%p1274_p4)
}
  0x2d   :  { %s1278_s20 = scalar_lea.vmem %s28_s15, 64  ;;  %p1283_p6 = scmp.lt.s32.totalorder %s28_s15, %s28_s15 }
  0x2e   :  { %p1279_p5 = scmp.ne.s32.totalorder %s28_s15, %s1278_s20  ;;  %p1284_p7 = scmp.lt.s32.totalorder %s1278_s20, %s1278_s20 }
  0x30   :  { %p1285_p8 = por %p1284_p7, %p1283_p6 }
  0x32   :  { %p1286_p9 = pnand %p1285_p8, %p1279_p5 }
  0x34   :  { %1289 = shalt.err (!%p1286_p9)
}
  0x35   :  { %30 = dma.hbm_to_vmem [thread:$0]  %s1596_s0, 64, %s28_s15, [#allocation3]  }
  0x36   :  { %s1395_s21 = smov [#allocation7]   ;;  %s1396_s23 = smov [#allocation10]  }
  0x37   :  { %s50_s22 = sshll.u32 %s1395_s21, 4  ;;  %s78_s1 = sshll.u32 %s1396_s23, 4  ;;  %s51_s22 = int_to_ptr.vmem [resolvable:$true] %s50_s22  ;;  %s79_s1 = int_to_ptr.vmem [resolvable:$true] %s78_s1 }
  0x38   :  { %s1290_s29 = scalar_lea.hbm %s1599_s3, 2048 }
  0x39   :  { %p1291_p10 = scmp.ne.s32.totalorder %s1599_s3, %s1290_s29  ;;  %p1294_p11 = scmp.lt.u32.totalorder %s1290_s29, %s1599_s3 }
  0x3b   :  { %p1296_p12 = pnand %p1294_p11, %p1291_p10 }
  0x3d   :  { %1299 = shalt.err (!%p1296_p12)
}
  0x3e   :  { %s1300_s0 = scalar_lea.vmem %s51_s22, 2048  ;;  %p1305_p0 = scmp.lt.s32.totalorder %s51_s22, %s51_s22 }
  0x3f   :  { %p1301_p13 = scmp.ne.s32.totalorder %s51_s22, %s1300_s0  ;;  %p1306_p1 = scmp.lt.s32.totalorder %s1300_s0, %s1300_s0 }
  0x41   :  { %p1307_p2 = por %p1306_p1, %p1305_p0 }
  0x43   :  { %p1308_p3 = pnand %p1307_p2, %p1301_p13 }
  0x45   :  { %1311 = shalt.err (!%p1308_p3)
}
  0x46   :  { %56 = dma.hbm_to_vmem [thread:$0]  %s1599_s3, 2048, %s51_s22, [#allocation6], %s1393_s18, %s1393_s18, %s1394_s24  }
  0x47   :  { %s1312_s5 = scalar_lea.hbm %s1603_s7, 2048 }
  0x48   :  { %p1313_p4 = scmp.ne.s32.totalorder %s1603_s7, %s1312_s5  ;;  %p1316_p5 = scmp.lt.u32.totalorder %s1312_s5, %s1603_s7 }
  0x4a   :  { %p1318_p6 = pnand %p1316_p5, %p1313_p4 }
  0x4c   :  { %1321 = shalt.err (!%p1318_p6)
}
  0x4d   :  { %s1322_s26 = scalar_lea.vmem %s79_s1, 2048  ;;  %p1327_p8 = scmp.lt.s32.totalorder %s79_s1, %s79_s1 }
  0x4e   :  { %p1323_p7 = scmp.ne.s32.totalorder %s79_s1, %s1322_s26  ;;  %p1328_p9 = scmp.lt.s32.totalorder %s1322_s26, %s1322_s26 }
  0x50   :  { %p1329_p10 = por %p1328_p9, %p1327_p8 }
  0x52   :  { %p1330_p11 = pnand %p1329_p10, %p1323_p7 }
  0x54   :  { %1333 = shalt.err (!%p1330_p11)
}
  0x55   :  { %84 = dma.hbm_to_vmem [thread:$0]  %s1603_s7, 2048, %s79_s1, [#allocation9], %s1389_s27, %s1389_s27, %s1390_s28  }
  0x56   :  { %s1397_s24 = smov [#allocation11]   ;;  %s1334_s12 = scalar_lea.hbm %s1605_s9, 1024 }
  0x57   :  { %s92_s22 = sshll.u32 %s1397_s24, 4  ;;  %p1335_p12 = scmp.ne.s32.totalorder %s1605_s9, %s1334_s12  ;;  %s93_s22 = int_to_ptr.vmem [resolvable:$true] %s92_s22 }
  0x58   :  { %p1338_p13 = scmp.lt.u32.totalorder %s1334_s12, %s1605_s9 }
  0x5a   :  { %p1340_p0 = pnand %p1338_p13, %p1335_p12 }
  0x5c   :  { %1343 = shalt.err (!%p1340_p0)
}
  0x5d   :  { %s1344_s17 = scalar_lea.vmem %s93_s22, 1024  ;;  %p1349_p2 = scmp.lt.s32.totalorder %s93_s22, %s93_s22 }
  0x5e   :  { %p1345_p1 = scmp.ne.s32.totalorder %s93_s22, %s1344_s17  ;;  %p1350_p3 = scmp.lt.s32.totalorder %s1344_s17, %s1344_s17 }
  0x60   :  { %p1351_p4 = por %p1350_p3, %p1349_p2 }
  0x62   :  { %p1352_p5 = pnand %p1351_p4, %p1345_p1 }
  0x64   :  { %1355 = shalt.err (!%p1352_p5)
}
  0x65   :  { %98 = dma.hbm_to_vmem [thread:$0]  %s1605_s9, 1024, %s93_s22, [#allocation12], %s1389_s27, %s1389_s27, %s1390_s28  }
  0x66   :  { %1378 = dma.done.wait [#allocation3], 64  }
  0x67   :  { %1379 = vsyncadd [#allocation3], 4294967232 }
  0x68   :  { %1380 = dma.done.wait [#allocation6], 3072  }
  0x69   :  { %1381 = vsyncadd [#allocation6], 4294964224 }
  0x6a   :  { %1382 = dma.done.wait [#allocation9], 6144  }
  0x6b   :  { %1383 = vsyncadd [#allocation9], 4294961152 }
  0x6c   :  { %1384 = dma.done.wait [#allocation12], 1024  }
  0x6d   :  { %1385 = vsyncadd [#allocation12], 4294966272  ;;  %v1398_v0 = vmov 0.0   ;;  %vm1399_vm0 = vmmov 0   ;;  %v1120_v1 = vld [vmem:[#allocation5] sm:$0xff]   ;;  %v1121_v2 = vld [vmem:[#allocation5 + $0x8] sm:$0xff]  }
  0x6e   :  { %1066 = vmatprep.subr.bf16.mxu0 %v1398_v0  ;;  %1082 = vmatprep.mubr.msk.bf16.mxu0 %vm1399_vm0, %v1398_v0  ;;  %v1122_v3 = vld [vmem:[#allocation5 + $0x10] sm:$0xff]   ;;  %v1128_v4 = vld [vmem:[#allocation7 + $0x4] ss:$8 sps:$4 sm:$0xff]   ;;  %v1130_v5 = vld [vmem:[#allocation7] ss:$8 sps:$4 sm:$0xff]   ;;  %v1400_v26 = vmov 0  }
  0x6f   :  { %1067 = vmatpush3.bf16.msra.mxu0 %v1120_v1  ;;  %v1123_v6 = vld [vmem:[#allocation5 + $0x18] sm:$0xff]   ;;  %342 = vmatprep.subr.bf16.mxu1 %v1128_v4  ;;  %v1134_v9 = vld [vmem:[#allocation7 + $0x24] ss:$8 sps:$4 sm:$0xff]   ;;  %v1136_v11 = vld [vmem:[#allocation7 + $0x20] ss:$8 sps:$4 sm:$0xff]   ;;  %s1401_s21 = smov [#allocation13]  }
  0x70   :  { %1068 = vmatprep.subr.bf16.mxu0 %v1398_v0  ;;  %v1131_v7 = vld [vmem:[#allocation7 + $0x14] ss:$8 sps:$4 sm:$0xff]   ;;  %343 = vmatpush1.bf16.msra.mxu1 %v1130_v5  ;;  %v1133_v8 = vld [vmem:[#allocation7 + $0x10] ss:$8 sps:$4 sm:$0xff]   ;;  %v1124_v10 = vld [vmem:[#allocation5 + $0x20] sm:$0xff]   ;;  %s931_s23 = sshll.u32 %s1401_s21, 4  ;;  %s932_s23 = int_to_ptr.vmem [resolvable:$true] %s931_s23 }
  0x71   :  { %344 = vmatprep.subr.bf16.mxu1 %v1131_v7  ;;  %v1125_v12 = vld [vmem:[#allocation5 + $0x28] sm:$0xff]   ;;  %v1137_v13 = vld [vmem:[#allocation7 + $0x34] ss:$8 sps:$4 sm:$0xff]   ;;  %v1139_v14 = vld [vmem:[#allocation7 + $0x30] ss:$8 sps:$4 sm:$0xff]   ;;  %374 = vmatprep.mubr.bf16.mxu1 %v1400_v26  ;;  %p1361_p7 = scmp.lt.s32.totalorder %s932_s23, %s932_s23 }
  0x72   :  { %v1140_v15 = vld [vmem:[#allocation7 + $0x44] ss:$8 sps:$4 sm:$0xff]   ;;  %v1126_v16 = vld [vmem:[#allocation5 + $0x30] sm:$0xff]   ;;  %v1142_v17 = vld [vmem:[#allocation7 + $0x40] ss:$8 sps:$4 sm:$0xff]  }
  0x73   :  { %1069 = vmatpush3.bf16.msra.mxu0 %v1121_v2  ;;  %v1143_v18 = vld [vmem:[#allocation7 + $0x54] ss:$8 sps:$4 sm:$0xff]   ;;  %v1145_v20 = vld [vmem:[#allocation7 + $0x50] ss:$8 sps:$4 sm:$0xff]   ;;  %v1146_v21 = vld [vmem:[#allocation7 + $0x64] ss:$8 sps:$4 sm:$0xff]  }
  0x74   :  { %1070 = vmatprep.subr.bf16.mxu0 %v1398_v0  ;;  %345 = vmatpush1.bf16.msra.mxu1 %v1133_v8  ;;  %v1127_v19 = vld [vmem:[#allocation5 + $0x38] sm:$0xff]   ;;  %v1148_v23 = vld [vmem:[#allocation7 + $0x60] ss:$8 sps:$4 sm:$0xff]   ;;  %v1154_v28 = vld [vmem:[#allocation8 + $0x4] ss:$8 sps:$4 sm:$0xff]  }
  0x75   :  { %346 = vmatprep.subr.bf16.mxu1 %v1134_v9  ;;  %v120_v22 = vld [vmem:[#allocation2] sm:$0xf]  ;;  %v1151_v25 = vld [vmem:[#allocation7 + $0x70] ss:$8 sps:$4 sm:$0xff]   ;;  %v1152_v27 = vld [vmem:[#allocation8] ss:$8 sps:$4 sm:$0xff]  }
  0x76   :  { %v1149_v24 = vld [vmem:[#allocation7 + $0x74] ss:$8 sps:$4 sm:$0xff]   ;;  %v1155_v30 = vld [vmem:[#allocation8 + $0x10] ss:$8 sps:$4 sm:$0xff]   ;;  %v1160_v31 = vld [vmem:[#allocation8 + $0x24] ss:$8 sps:$4 sm:$0xff]  }
  0x77   :  { %1071 = vmatpush3.bf16.msra.mxu0 %v1122_v3  ;;  %v1157_v29 = vld [vmem:[#allocation8 + $0x14] ss:$8 sps:$4 sm:$0xff]   ;;  %v1158_v32 = vld [vmem:[#allocation8 + $0x20] ss:$8 sps:$4 sm:$0xff]   ;;  %v1161_v34 = vld [vmem:[#allocation8 + $0x30] ss:$8 sps:$4 sm:$0xff]  }
  0x78   :  { %1072 = vmatprep.subr.bf16.mxu0 %v1398_v0  ;;  %347 = vmatpush1.bf16.msra.mxu1 %v1136_v11  ;;  %v1163_v33 = vld [vmem:[#allocation8 + $0x34] ss:$8 sps:$4 sm:$0xff]   ;;  %v1166_v35 = vld [vmem:[#allocation8 + $0x44] ss:$8 sps:$4 sm:$0xff]   ;;  %v1164_v36 = vld [vmem:[#allocation8 + $0x40] ss:$8 sps:$4 sm:$0xff]  }
  0x79   :  { %348 = vmatprep.subr.bf16.mxu1 %v1137_v13  ;;  %v1169_v37 = vld [vmem:[#allocation8 + $0x54] ss:$8 sps:$4 sm:$0xff]   ;;  %v1167_v38 = vld [vmem:[#allocation8 + $0x50] ss:$8 sps:$4 sm:$0xff]   ;;  %v1172_v39 = vld [vmem:[#allocation8 + $0x64] ss:$8 sps:$4 sm:$0xff]  }
  0x7a   :  { %v1170_v40 = vld [vmem:[#allocation8 + $0x60] ss:$8 sps:$4 sm:$0xff]   ;;  %v1175_v41 = vld [vmem:[#allocation8 + $0x74] ss:$8 sps:$4 sm:$0xff]   ;;  %v1173_v42 = vld [vmem:[#allocation8 + $0x70] ss:$8 sps:$4 sm:$0xff]  }
  0x7b   :  { %1073 = vmatpush3.bf16.msra.mxu0 %v1123_v6  ;;  %v1178_v43 = vld [vmem:[#allocation8 + $0x84] ss:$8 sps:$4 sm:$0xff]   ;;  %v1176_v44 = vld [vmem:[#allocation8 + $0x80] ss:$8 sps:$4 sm:$0xff]   ;;  %v1181_v45 = vld [vmem:[#allocation8 + $0x94] ss:$8 sps:$4 sm:$0xff]  }
  0x7c   :  { %1074 = vmatprep.subr.bf16.mxu0 %v1398_v0  ;;  %349 = vmatpush1.bf16.msra.mxu1 %v1139_v14  ;;  %v1179_v46 = vld [vmem:[#allocation8 + $0x90] ss:$8 sps:$4 sm:$0xff]   ;;  %v1184_v47 = vld [vmem:[#allocation8 + $0xa4] ss:$8 sps:$4 sm:$0xff]   ;;  %v1182_v48 = vld [vmem:[#allocation8 + $0xa0] ss:$8 sps:$4 sm:$0xff]  }
  0x7d   :  { %350 = vmatprep.subr.bf16.mxu1 %v1140_v15  ;;  %v1187_v49 = vld [vmem:[#allocation8 + $0xb4] ss:$8 sps:$4 sm:$0xff]   ;;  %v1185_v50 = vld [vmem:[#allocation8 + $0xb0] ss:$8 sps:$4 sm:$0xff]   ;;  %v1190_v51 = vld [vmem:[#allocation8 + $0xc4] ss:$8 sps:$4 sm:$0xff]  }
  0x7e   :  { %v1188_v52 = vld [vmem:[#allocation8 + $0xc0] ss:$8 sps:$4 sm:$0xff]   ;;  %v1193_v53 = vld [vmem:[#allocation8 + $0xd4] ss:$8 sps:$4 sm:$0xff]   ;;  %v1191_v54 = vld [vmem:[#allocation8 + $0xd0] ss:$8 sps:$4 sm:$0xff]  }
  0x7f   :  { %1075 = vmatpush3.bf16.msra.mxu0 %v1124_v10  ;;  %v943_v55 = vld [vmem:[%s1598_s2] ss:$0 sm:$0xff]  ;;  %v1196_v63 = vld [vmem:[#allocation8 + $0xe4] ss:$8 sps:$4 sm:$0xff]   ;;  %v1194_v1 = vld [vmem:[#allocation8 + $0xe0] ss:$8 sps:$4 sm:$0xff]  }
  0x80   :  { %1076 = vmatprep.subr.bf16.mxu0 %v1398_v0  ;;  %351 = vmatpush1.bf16.msra.mxu1 %v1142_v17  ;;  %v1199_v2 = vld [vmem:[#allocation8 + $0xf4] ss:$8 sps:$4 sm:$0xff]   ;;  %v1197_v3 = vld [vmem:[#allocation8 + $0xf0] ss:$8 sps:$4 sm:$0xff]   ;;  %v1200_v4 = vld [vmem:[#allocation10 + $0x40] sm:$0xff]  }
  0x81   :  { %352 = vmatprep.subr.bf16.mxu1 %v1143_v18  ;;  %v1201_v5 = vld [vmem:[#allocation10] sm:$0xff]   ;;  %v1202_v6 = vld [vmem:[#allocation10 + $0x48] sm:$0xff]   ;;  %v1204_v8 = vld [vmem:[#allocation10 + $0x50] sm:$0xff]  }
  0x82   :  { %v1203_v7 = vld [vmem:[#allocation10 + $0x8] sm:$0xff]   ;;  %v1205_v9 = vld [vmem:[#allocation10 + $0x10] sm:$0xff]   ;;  %v1206_v10 = vld [vmem:[#allocation10 + $0x58] sm:$0xff]  }
  0x83   :  { %1077 = vmatpush3.bf16.msra.mxu0 %v1125_v12  ;;  %v1207_v11 = vld [vmem:[#allocation10 + $0x18] sm:$0xff]   ;;  %v1208_v12 = vld [vmem:[#allocation10 + $0x60] sm:$0xff]   ;;  %v1210_v14 = vld [vmem:[#allocation10 + $0x68] sm:$0xff]  }
  0x84   :  { %1078 = vmatprep.subr.bf16.mxu0 %v1398_v0  ;;  %353 = vmatpush1.bf16.msra.mxu1 %v1145_v20  ;;  %v1209_v13 = vld [vmem:[#allocation10 + $0x20] sm:$0xff]   ;;  %v1211_v15 = vld [vmem:[#allocation10 + $0x28] sm:$0xff]  }
  0x85   :  { %354 = vmatprep.subr.bf16.mxu1 %v1146_v21 }
  0x87   :  { %1079 = vmatpush3.bf16.msra.mxu0 %v1126_v16  ;;  %v252_v16 = vlaneseq }
  0x88   :  { %1080 = vmatprep.subr.bf16.mxu0 %v1398_v0  ;;  %355 = vmatpush1.bf16.msra.mxu1 %v1148_v23 }
  0x89   :  { %356 = vmatprep.subr.bf16.mxu1 %v1149_v24  ;;  %v253_v17 = vshrl.u32 %v252_v16, 7 }
  0x8b   :  { %1081 = vmatpush3.bf16.msra.mxu0 %v1127_v19  ;;  %v254_v18 = vsub.s32 0, %v253_v17  ;;  %v250_v19 = vld [vmem:[%s1600_s4] sm:$0x3]  ;;  %v258_v20 = vsub.s32 1, %v253_v17 }
  0x8c   :  { %357 = vmatpush1.bf16.msra.mxu1 %v1151_v25  ;;  %591 = vmatprep.subr.bf16.mxu0 %v1154_v28 }
  0x8d   :  { %1035 = vmatprep.subr.bf16.mxu1 %v1200_v4  ;;  %v255_v21 = vrot.slane %v250_v19, %v254_v18  ;;  %v1017_v4 = vld [vmem:[%s1606_s10] ss:$0 sm:$0xff] }
  0x8e   :  { %1083 = vmatmul.mubr.bf16.vlgmr.msra.gmra.mrb[0].mxu0 %v120_v22  ;;  %v259_v22 = vrot.slane %v250_v19, %v258_v20 }
  0x8f   :  { %592 = vmatpush1.bf16.msra.mxu0 %v1152_v27 }
  0x90   :  { %593 = vmatprep.subr.bf16.mxu0 %v1157_v29 }
  0x93   :  { %594 = vmatpush1.bf16.msra.mxu0 %v1155_v30 }
  0x94   :  { %595 = vmatprep.subr.bf16.mxu0 %v1160_v31 }
  0x97   :  { %596 = vmatpush1.bf16.msra.mxu0 %v1158_v32 }
  0x98   :  { %597 = vmatprep.subr.bf16.mxu0 %v1163_v33  ;;  %v1212_v33 = vld [vmem:[#allocation10 + $0x70] sm:$0xff]  }
  0x9b   :  { %598 = vmatpush1.bf16.msra.mxu0 %v1161_v34  ;;  %v1213_v34 = vld [vmem:[#allocation10 + $0x30] sm:$0xff]  }
  0x9c   :  { %599 = vmatprep.subr.bf16.mxu0 %v1166_v35  ;;  %v1214_v35 = vld [vmem:[#allocation10 + $0x78] sm:$0xff]  }
  0x9f   :  { %600 = vmatpush1.bf16.msra.mxu0 %v1164_v36  ;;  %v1215_v36 = vld [vmem:[#allocation10 + $0x38] sm:$0xff]  }
  0xa0   :  { %601 = vmatprep.subr.bf16.mxu0 %v1169_v37  ;;  %v419_v37 = vld [vmem:[%s1602_s6] sm:$0x3] }
  0xa3   :  { %602 = vmatpush1.bf16.msra.mxu0 %v1167_v38  ;;  %v424_v38 = vrot.slane %v419_v37, %v254_v18 }
  0xa4   :  { %603 = vmatprep.subr.bf16.mxu0 %v1172_v39  ;;  %v428_v39 = vrot.slane %v419_v37, %v258_v20 }
  0xa7   :  { %604 = vmatpush1.bf16.msra.mxu0 %v1170_v40 }
  0xa8   :  { %605 = vmatprep.subr.bf16.mxu0 %v1175_v41 }
  0xab   :  { %606 = vmatpush1.bf16.msra.mxu0 %v1173_v42 }
  0xac   :  { %607 = vmatprep.subr.bf16.mxu0 %v1178_v43 }
  0xaf   :  { %608 = vmatpush1.bf16.msra.mxu0 %v1176_v44 }
  0xb0   :  { %609 = vmatprep.subr.bf16.mxu0 %v1181_v45 }
  0xb3   :  { %610 = vmatpush1.bf16.msra.mxu0 %v1179_v46 }
  0xb4   :  { %611 = vmatprep.subr.bf16.mxu0 %v1184_v47 }
  0xb7   :  { %612 = vmatpush1.bf16.msra.mxu0 %v1182_v48 }
  0xb8   :  { %613 = vmatprep.subr.bf16.mxu0 %v1187_v49  ;;  %v1216_v49 = vld [vmem:[#allocation11] sm:$0xff]  }
  0xbb   :  { %614 = vmatpush1.bf16.msra.mxu0 %v1185_v50 }
  0xbc   :  { %615 = vmatprep.subr.bf16.mxu0 %v1190_v51  ;;  %v1217_v51 = vld [vmem:[#allocation11 + $0x8] sm:$0xff]  }
  0xbf   :  { %616 = vmatpush1.bf16.msra.mxu0 %v1188_v52  ;;  %v1218_v52 = vld [vmem:[#allocation11 + $0x10] sm:$0xff]  }
  0xc0   :  { %617 = vmatprep.subr.bf16.mxu0 %v1193_v53  ;;  %v1219_v53 = vld [vmem:[#allocation11 + $0x18] sm:$0xff]  }
  0xc3   :  { %618 = vmatpush1.bf16.msra.mxu0 %v1191_v54  ;;  %v1220_v54 = vld [vmem:[#allocation11 + $0x20] sm:$0xff]  }
  0xc4   :  { %619 = vmatprep.subr.bf16.mxu0 %v1196_v63 }
  0xc7   :  { %620 = vmatpush1.bf16.msra.mxu0 %v1194_v1 }
  0xc8   :  { %621 = vmatprep.subr.bf16.mxu0 %v1199_v2 }
  0xcb   :  { %622 = vmatpush1.bf16.msra.mxu0 %v1197_v3 }
 0x161   :  { %v226_v56 = vpop.f32.mrb[0].mxu0 }
 0x162   :  { %v227_v57 = vadd.f32 %v943_v55, %v226_v56  ;;  %v1084_v58 = vpop.f32.mrb[1].mxu0  ;;  %v1221_v55 = vld [vmem:[#allocation11 + $0x28] sm:$0xff]   ;;  %v1222_v56 = vld [vmem:[#allocation11 + $0x30] sm:$0xff]  }
 0x163   :  { %v229_v59 = vpop.f32.mrb[2].mxu0 }
 0x164   :  { %v232_v60 = vmax.f32 %v227_v57, 0.0  ;;  %v1085_v61 = vpop.f32.mrb[3].mxu0  ;;  %v1223_v57 = vld [vmem:[#allocation11 + $0x38] sm:$0xff]  }
 0x165   :  { %v1000_v59 = vld [vmem:[%s1604_s8] ss:$0 sm:$0xff]  ;;  %s1356_s8 = scalar_lea.vmem %s932_s23, 128 }
 0x166   :  { %v233_v62 = vpack.c.bf16 %v232_v60, %v232_v60  ;;  %p1357_p6 = scmp.ne.s32.totalorder %s932_s23, %s1356_s8  ;;  %p1362_p8 = scmp.lt.s32.totalorder %s1356_s8, %s1356_s8 }
 0x168   :  { %375 = vmatmul.mubr.bf16.vlgmr.msra.gmra.mrb[0].mxu1 %v233_v62  ;;  %p1363_p9 = por %p1362_p8, %p1361_p7 }
 0x169   :  { %1036 = vmatpush3.bf16.msra.mxu1 %v1201_v5 }
 0x16a   :  { %1037 = vmatprep.subr.bf16.mxu1 %v1202_v6  ;;  %p1364_p10 = pnand %p1363_p9, %p1357_p6 }
 0x16d   :  { %1038 = vmatpush3.bf16.msra.mxu1 %v1203_v7 }
 0x16e   :  { %1039 = vmatprep.subr.bf16.mxu1 %v1204_v8 }
 0x171   :  { %1040 = vmatpush3.bf16.msra.mxu1 %v1205_v9 }
 0x172   :  { %1041 = vmatprep.subr.bf16.mxu1 %v1206_v10 }
 0x175   :  { %1042 = vmatpush3.bf16.msra.mxu1 %v1207_v11 }
 0x176   :  { %1043 = vmatprep.subr.bf16.mxu1 %v1208_v12 }
 0x179   :  { %1044 = vmatpush3.bf16.msra.mxu1 %v1209_v13 }
 0x17a   :  { %1045 = vmatprep.subr.bf16.mxu1 %v1210_v14 }
 0x17d   :  { %1046 = vmatpush3.bf16.msra.mxu1 %v1211_v15 }
 0x17e   :  { %1047 = vmatprep.subr.bf16.mxu1 %v1212_v33 }
 0x181   :  { %1048 = vmatpush3.bf16.msra.mxu1 %v1213_v34 }
 0x182   :  { %1049 = vmatprep.subr.bf16.mxu1 %v1214_v35 }
 0x185   :  { %1050 = vmatpush3.bf16.msra.mxu1 %v1215_v36 }
 0x186   :  { %1086 = vmatprep.subr.bf16.mxu1 %v1398_v0 }
 0x23b   :  { %v376_v23 = vpop.f32.mrb[0].mxu1 }
 0x23c   :  { %v377_v24 = vadd.f32 %v376_v23, %v255_v21  ;;  %v378_v25 = vpop.f32.mrb[1].mxu1 }
 0x23d   :  { %v379_v26 = vadd.f32 %v378_v25, %v259_v22  ;;  %v380_v27 = vpop.f32.mrb[2].mxu1 }
 0x23e   :  { %v383_v28 = vmax.f32 %v377_v24, 0.0  ;;  %v381_v29 = vpop.f32.mrb[3].mxu1 }
 0x23f   :  { %v384_v30 = vmax.f32 %v379_v26, 0.0 }
 0x240   :  { %v385_v32 = vpack.c.bf16 %v383_v28, %v383_v28 }
 0x241   :  { %v386_v31 = vpack.c.bf16 %v384_v30, %v384_v30 }
 0x243   :  { %623 = vmatprep.mubr.bf16.mxu0 %v386_v31 }
 0x244   :  { %624 = vmatmul.mubr.bf16.vlgmr.msra.gmra.mrb[4].mxu0 %v385_v32 }
 0x317   :  { %v625_v40 = vpop.f32.mrb[4].mxu0 }
 0x318   :  { %v626_v41 = vadd.f32 %v625_v40, %v424_v38  ;;  %v627_v42 = vpop.f32.mrb[5].mxu0 }
 0x319   :  { %v628_v43 = vadd.f32 %v627_v42, %v428_v39  ;;  %v629_v44 = vpop.f32.mrb[6].mxu0 }
 0x31a   :  { %v632_v45 = vmax.f32 %v626_v41, 0.0  ;;  %v630_v46 = vpop.f32.mrb[7].mxu0 }
 0x31b   :  { %v633_v47 = vmax.f32 %v628_v43, 0.0 }
 0x31c   :  { %v634_v50 = vpack.c.bf16 %v632_v45, %v632_v45 }
 0x31d   :  { %v635_v48 = vpack.c.bf16 %v633_v47, %v633_v47 }
 0x31f   :  { %803 = vmatprep.mubr.bf16.mxu1 %v635_v48 }
 0x320   :  { %804 = vmatmul.mubr.bf16.vlgmr.msra.gmra.mrb[4].mxu1 %v634_v50 }
 0x321   :  { %1087 = vmatpush3.bf16.msra.mxu1 %v1216_v49  ;;  %1102 = vmatprep.mubr.msk.bf16.mxu1 %vm1399_vm0, %v1398_v0 }
 0x322   :  { %1088 = vmatprep.subr.bf16.mxu1 %v1398_v0 }
 0x325   :  { %1089 = vmatpush3.bf16.msra.mxu1 %v1217_v51 }
 0x326   :  { %1090 = vmatprep.subr.bf16.mxu1 %v1398_v0 }
 0x329   :  { %1091 = vmatpush3.bf16.msra.mxu1 %v1218_v52 }
 0x32a   :  { %1092 = vmatprep.subr.bf16.mxu1 %v1398_v0 }
 0x32d   :  { %1093 = vmatpush3.bf16.msra.mxu1 %v1219_v53 }
 0x32e   :  { %1094 = vmatprep.subr.bf16.mxu1 %v1398_v0 }
 0x331   :  { %1095 = vmatpush3.bf16.msra.mxu1 %v1220_v54 }
 0x332   :  { %1096 = vmatprep.subr.bf16.mxu1 %v1398_v0 }
 0x335   :  { %1097 = vmatpush3.bf16.msra.mxu1 %v1221_v55 }
 0x336   :  { %1098 = vmatprep.subr.bf16.mxu1 %v1398_v0 }
 0x339   :  { %1099 = vmatpush3.bf16.msra.mxu1 %v1222_v56 }
 0x33a   :  { %1100 = vmatprep.subr.bf16.mxu1 %v1398_v0 }
 0x33d   :  { %1101 = vmatpush3.bf16.msra.mxu1 %v1223_v57 }
 0x3f3   :  { %v1051_v58 = vpop.f32.mrb[4].mxu1 }
 0x3f4   :  { %v1052_v60 = vpop.f32.mrb[5].mxu1 }
 0x3f5   :  { %v1053_v61 = vadd.f32 %v1052_v60, %v1051_v58  ;;  %v1054_v62 = vpop.f32.mrb[6].mxu1 }
 0x3f6   :  { %v1055_v63 = vpop.f32.mrb[7].mxu1 }
 0x3f7   :  { %v806_v1 = vadd.f32 %v1053_v61, %v1000_v59 }
 0x3f9   :  { %v811_v2 = vmax.f32 %v806_v1, 0.0 }
 0x3fb   :  { %v812_v3 = vpack.c.bf16 %v811_v2, %v811_v2 }
 0x3fd   :  { %1103 = vmatmul.mubr.bf16.vlgmr.msra.gmra.mrb[8].mxu1 %v812_v3 }
 0x4d0   :  { %v918_v0 = vpop.f32.mrb[8].mxu1 }
 0x4d1   :  { %v919_v5 = vadd.f32 %v1017_v4, %v918_v0  ;;  %v1104_v6 = vpop.f32.mrb[9].mxu1 }
 0x4d2   :  { %v921_v7 = vpop.f32.mrb[10].mxu1 }
 0x4d3   :  { %924 = vst [vmem:[#allocation13] sm:$0xff] %v919_v5  ;;  %v1105_v8 = vpop.f32.mrb[11].mxu1 }
 0x4d4   :  { %1367 = shalt.err (!%p1364_p10)
}
 0x4d5   :  { %s1368_s10 = scalar_lea.hbm %s1607_s11, 128 }
 0x4d6   :  { %p1369_p11 = scmp.ne.s32.totalorder %s1607_s11, %s1368_s10  ;;  %p1372_p12 = scmp.lt.u32.totalorder %s1368_s10, %s1607_s11 }
 0x4d8   :  { %p1374_p13 = pnand %p1372_p12, %p1369_p11 }
 0x4da   :  { %1377 = shalt.err (!%p1374_p13)
}
 0x4db   :  { %934 = dma.vmem_to_hbm [thread:$0]  %s932_s23, 128, %s1607_s11, [#allocation4]  }
 0x4dc   :  { %1386 = dma.done.wait [#allocation4], 128  }
 0x4dd   :  { %1387 = vsyncadd [#allocation4], 4294967168 }
 0x4de   :  { %938 = vsyncpa [#allocation3], 1 }
 0x4df   :  { %939 = vsyncpa [#allocation6], 1 }
 0x4e0   :  { %940 = vsyncpa [#allocation9], 1 }
 0x4e1   :  { %941 = vsyncpa [#allocation12], 1 }
 0x4e2   :  { %942 = vsyncpa [#allocation4], 1 }

</bundles_post_ra>
